<compile_context>
chip_gen: v6e
topology: v6e:2x2x1
jax: 0.10.0
libtpu: 0.0.40
codegen_flags: <defaults>
</compile_context>

<pallas_src>
import functools

import jax
import jax.numpy as jnp
from jax.experimental import pallas as pl
from jax.experimental.pallas import tpu as pltpu

NUM_LAYERS = 4
LEAKY_SLOPE = 0.01   # nn.LeakyReLU() default (the module's activate_function)
GAT_SLOPE = 0.2      # GATConv's internal attention LeakyReLU
LANE = 128
SUBLANE = 8
VMEM_LIMIT = 32 * 1024 * 1024   # explicit scoped-VMEM budget, safe on v5e/v6e/v7x


def _round_up(a, b):
    return ((a + b - 1) // b) * b


def _pad_n(n):
    n8 = _round_up(max(n, SUBLANE), SUBLANE)
    if n8 <= 256:
        return n8
    return _round_up(n8, 512)


def _tile_sizes(n_pad):
    if n_pad <= 256:
        return n_pad, n_pad       # single tile
    return 256, 512               # TM (dst rows), TK (src cols)


def _leaky(v, slope):
    return jnp.where(v > 0, v, slope * v)


# --------------------- kernel A: input Linear + LeakyReLU ---------------------
def _input_kernel(x_ref, w_ref, b_ref, o_ref):
    y = jnp.dot(x_ref[...], w_ref[...],
                preferred_element_type=jnp.float32) + b_ref[...]
    o_ref[...] = _leaky(y, LEAKY_SLOPE)


# ---------- kernel B: xw = x @ W  +  per-node attention logits (VPU) ----------
def _xw_kernel(x_ref, w_ref, asrc_ref, adst_ref,
               xw_ref, adst_out_ref, asrc_out_ref):
    xw = jnp.dot(x_ref[...].astype(jnp.bfloat16), w_ref[...],
                 preferred_element_type=jnp.float32)           # (TM, E) f32
    xw_ref[...] = xw.astype(jnp.bfloat16)
    # per-node logits: VPU multiply + lane reduce (keeps MXU free)
    adst_out_ref[...] = jnp.sum(xw * adst_ref[...], axis=-1, keepdims=True)
    asrc_out_ref[...] = jnp.sum(xw * asrc_ref[...], axis=-1, keepdims=True)


# ---------- kernel C: masked softmax aggregation (online / flash-style) -------
def _attn_kernel(adj_ref, xw_ref, adst_ref, asrc_ref, bias_ref, o_ref,
                 m_sc, l_sc, acc_sc):
    k = pl.program_id(1)

    @pl.when(k == 0)
    def _():
        m_sc[...] = jnp.full_like(m_sc, -1e30)
        l_sc[...] = jnp.zeros_like(l_sc)
        acc_sc[...] = jnp.zeros_like(acc_sc)

    mask = adj_ref[...].astype(jnp.float32)                    # (TM, TK)
    # e_ij = leaky(alpha_dst_i + alpha_src_j)
    e = _leaky(adst_ref[...] + asrc_ref[...], GAT_SLOPE)       # (TM,1)+(1,TK)
    m_prev = m_sc[...]
    m_new = jnp.maximum(m_prev, jnp.max(e, axis=1, keepdims=True))
    p = jnp.exp(e - m_new) * mask                              # single masking pass
    scale = jnp.exp(m_prev - m_new)
    l_sc[...] = scale * l_sc[...] + jnp.sum(p, axis=1, keepdims=True)
    acc_sc[...] = scale * acc_sc[...] + jnp.dot(
        p.astype(jnp.bfloat16), xw_ref[...],
        preferred_element_type=jnp.float32)
    m_sc[...] = m_new

    @pl.when(k == pl.num_programs(1) - 1)
    def _():
        denom = l_sc[...]
        inv = jnp.where(denom > 0,
                        pl.reciprocal(jnp.maximum(denom, 1e-30), approx=True),
                        0.0)
        out = acc_sc[...] * inv + bias_ref[...]
        # F.dropout(p=0.3, training=False) -> identity in eval mode
        o_ref[...] = _leaky(out, LEAKY_SLOPE)


# ------------------------------- wrappers -------------------------------------
def _input_proj(x_pad, w_in, b_in, tm):
    n_pad, f_in = x_pad.shape
    emb_pad = w_in.shape[1]
    return pl.pallas_call(
        _input_kernel,
        grid=(n_pad // tm,),
        in_specs=[
            pl.BlockSpec((tm, f_in), lambda i: (i, 0)),
            pl.BlockSpec((f_in, emb_pad), lambda i: (0, 0)),   # resident weights
            pl.BlockSpec((1, emb_pad), lambda i: (0, 0)),
        ],
        out_specs=pl.BlockSpec((tm, emb_pad), lambda i: (i, 0)),
        out_shape=jax.ShapeDtypeStruct((n_pad, emb_pad), jnp.float32),
        compiler_params=pltpu.CompilerParams(
            dimension_semantics=("parallel",),
            vmem_limit_bytes=VMEM_LIMIT),
    )(x_pad, w_in, b_in)


def _xw_alpha(x, w_l, att_src, att_dst, tm):
    n_pad, emb_pad = x.shape
    return pl.pallas_call(
        _xw_kernel,
        grid=(n_pad // tm,),
        in_specs=[
            pl.BlockSpec((tm, emb_pad), lambda i: (i, 0)),
            pl.BlockSpec((emb_pad, emb_pad), lambda i: (0, 0)),  # resident
            pl.BlockSpec((1, emb_pad), lambda i: (0, 0)),
            pl.BlockSpec((1, emb_pad), lambda i: (0, 0)),
        ],
        out_specs=(
            pl.BlockSpec((tm, emb_pad), lambda i: (i, 0)),
            pl.BlockSpec((tm, 1), lambda i: (i, 0)),
            pl.BlockSpec((tm, 1), lambda i: (i, 0)),
        ),
        out_shape=(
            jax.ShapeDtypeStruct((n_pad, emb_pad), jnp.bfloat16),
            jax.ShapeDtypeStruct((n_pad, 1), jnp.float32),
            jax.ShapeDtypeStruct((n_pad, 1), jnp.float32),
        ),
        compiler_params=pltpu.CompilerParams(
            dimension_semantics=("parallel",),
            vmem_limit_bytes=VMEM_LIMIT),
    )(x, w_l, att_src, att_dst)


def _gat_aggregate(adj, xw, alpha_dst, alpha_src_row, bias_l, tm, tk):
    n_pad = adj.shape[0]
    emb_pad = xw.shape[1]
    return pl.pallas_call(
        _attn_kernel,
        grid=(n_pad // tm, n_pad // tk),
        in_specs=[
            pl.BlockSpec((tm, tk), lambda i, k: (i, k)),        # adj tile (bf16)
            pl.BlockSpec((tk, emb_pad), lambda i, k: (k, 0)),   # xw source tile
            pl.BlockSpec((tm, 1), lambda i, k: (i, 0)),         # alpha_dst column
            pl.BlockSpec((1, tk), lambda i, k: (0, k)),         # alpha_src row
            pl.BlockSpec((1, emb_pad), lambda i, k: (0, 0)),    # bias (resident)
        ],
        out_specs=pl.BlockSpec((tm, emb_pad), lambda i, k: (i, 0)),
        out_shape=jax.ShapeDtypeStruct((n_pad, emb_pad), jnp.float32),
        scratch_shapes=[
            pltpu.VMEM((tm, 1), jnp.float32),       # running max
            pltpu.VMEM((tm, 1), jnp.float32),       # running denom
            pltpu.VMEM((tm, emb_pad), jnp.float32), # running accumulator
        ],
        compiler_params=pltpu.CompilerParams(
            dimension_semantics=("parallel", "arbitrary"),
            vmem_limit_bytes=VMEM_LIMIT),
    )(adj, xw, alpha_dst, alpha_src_row, bias_l)


@functools.partial(jax.jit, static_argnames=("acummulate",))
def graph_encoder_forward(x, edge_index, params, acummulate=False):
    n, _ = x.shape
    emb = params["w_in"].shape[1]
    num_layers = params["w"].shape[0]

    emb_pad = _round_up(emb, LANE)
    n_pad = _pad_n(n)
    tm, tk = _tile_sizes(n_pad)
    ep = emb_pad - emb

    # zero-padding of params / inputs is exactly equivalent (padded rows/cols stay 0)
    w_in = jnp.pad(params["w_in"], ((0, 0), (0, ep)))
    b_in = jnp.pad(params["b_in"], ((0, 0), (0, ep)))
    w = jnp.pad(params["w"], ((0, 0), (0, ep), (0, ep))).astype(jnp.bfloat16)
    att_src = jnp.pad(params["a_src"], ((0, 0), (0, 0), (0, ep)))
    att_dst = jnp.pad(params["a_dst"], ((0, 0), (0, 0), (0, ep)))
    bias = jnp.pad(params["bias"], ((0, 0), (0, 0), (0, ep)))
    x_pad = jnp.pad(x, ((0, n_pad - n), (0, 0)))

    # dense adjacency mask in bf16: adj[i, j] = 1 iff edge j -> i
    adj = jnp.zeros((n_pad, n_pad), jnp.bfloat16).at[
        edge_index[1], edge_index[0]].set(1.0)

    # input Linear + LeakyReLU  (BatchNorm1d skipped: remove_random=True)
    xcur = _input_proj(x_pad, w_in, b_in, tm)

    xs_layers = []
    for l in range(num_layers):
        xw, alpha_dst, alpha_src = _xw_alpha(xcur, w[l], att_src[l], att_dst[l], tm)
        alpha_src_row = alpha_src.reshape(1, n_pad)
        xcur = _gat_aggregate(adj, xw, alpha_dst, alpha_src_row, bias[l], tm, tk)
        xs_layers.append(xcur[:n, :emb])

    x_out = xs_layers[-1]
    h = jnp.zeros_like(x_out)
    for xl in xs_layers:
        h = h + 0.5 * xl
    # torch.stack([x_l.view(-1)], dim=1): all layers have equal size (heads=1,
    # constant emb), so no F.pad is needed.
    xs = jnp.stack([xl.reshape(-1) for xl in xs_layers], axis=1)   # (N*emb, L)

    if acummulate:
        return x_out, h, xs
    return x_out, x_out, xs


def init_params(key, num_features, embedding_size, num_layers):
    ks = jax.random.split(key, 6)
    s = 0.1
    return {
        "w_in": s * jax.random.normal(ks[0], (num_features, embedding_size), jnp.float32),
        "b_in": s * jax.random.normal(ks[1], (1, embedding_size), jnp.float32),
        "w": s * jax.random.normal(ks[2], (num_layers, embedding_size, embedding_size), jnp.float32),
        "a_src": s * jax.random.normal(ks[3], (num_layers, 1, embedding_size), jnp.float32),
        "a_dst": s * jax.random.normal(ks[4], (num_layers, 1, embedding_size), jnp.float32),
        "bias": s * jax.random.normal(ks[5], (num_layers, 1, embedding_size), jnp.float32),
    }


if __name__ == "__main__":
    key = jax.random.PRNGKey(0)
    N, F_IN, EMB = 8, 16, 32

    kx, kp = jax.random.split(key)
    x = jax.random.normal(kx, (N, F_IN), jnp.float32)

    # deterministic small graph: a ring plus a few chords (src row, dst row)
    src = jnp.array([0, 1, 2, 3, 4, 5, 6, 7, 0, 2, 4, 6], jnp.int32)
    dst = jnp.array([1, 2, 3, 4, 5, 6, 7, 0, 4, 6, 0, 2], jnp.int32)
    edge_index = jnp.stack([src, dst])                                  # (2, E)

    params = init_params(kp, F_IN, EMB, NUM_LAYERS)

    x_out, x_dup, xs = graph_encoder_forward(x, edge_index, params, acummulate=False)
    jax.block_until_ready((x_out, x_dup, xs))

    assert x_out.shape == (N, EMB)
    assert x_dup.shape == (N, EMB)
    assert xs.shape == (N * EMB, NUM_LAYERS)
    assert bool(jnp.isfinite(x_out).all()) and bool(jnp.isfinite(xs).all())
    print("KERNEL_OK")
</pallas_src>

<mosaic_0001>
module attributes {stable_mosaic.version = 11 : i64} {
  func.func @_input_kernel(%arg0: i32, %arg1: memref<8x16xf32, #tpu.memory_space<vmem>>, %arg2: memref<16x128xf32, #tpu.memory_space<vmem>>, %arg3: memref<1x128xf32, #tpu.memory_space<vmem>>, %arg4: memref<8x128xf32, #tpu.memory_space<vmem>>) attributes {dimension_semantics = [#tpu.dimension_semantics<parallel>], iteration_bounds = array<i64: 1>, scalar_prefetch = 0 : i64, scratch_operands = 0 : i64, tpu.core_type = #tpu.core_type<tc>, window_params = [{transform_indices = @transform_0, window_bounds = array<i64: 8, 16>}, {pipeline_mode = #tpu.pipeline_mode<synchronous>, transform_indices = @transform_1, window_bounds = array<i64: 16, 128>}, {pipeline_mode = #tpu.pipeline_mode<synchronous>, transform_indices = @transform_2, window_bounds = array<i64: 1, 128>}, {transform_indices = @transform_3, window_bounds = array<i64: 8, 128>}]} {
    %c0 = arith.constant 0 : index
    %c0_0 = arith.constant 0 : index
    %0 = vector.load %arg1[%c0, %c0_0] : memref<8x16xf32, #tpu.memory_space<vmem>>, vector<8x16xf32>
    %c0_1 = arith.constant 0 : index
    %c0_2 = arith.constant 0 : index
    %1 = vector.load %arg2[%c0_1, %c0_2] : memref<16x128xf32, #tpu.memory_space<vmem>>, vector<16x128xf32>
    %cst = arith.constant dense<0.000000e+00> : vector<8x128xf32>
    %2 = tpu.matmul %0, %1, %cst {dimension_numbers = #tpu.dot_dimension_numbers<[1], [0], [0], [1], [0, 0, 1, 1], [], []>} : vector<8x16xf32>, vector<16x128xf32>, vector<8x128xf32> -> vector<8x128xf32>
    %c0_3 = arith.constant 0 : index
    %c0_4 = arith.constant 0 : index
    %3 = vector.load %arg3[%c0_3, %c0_4] : memref<1x128xf32, #tpu.memory_space<vmem>>, vector<1x128xf32>
    %4 = vector.broadcast %3 : vector<1x128xf32> to vector<8x128xf32>
    %5 = arith.addf %2, %4 : vector<8x128xf32>
    %cst_5 = arith.constant 0.000000e+00 : f32
    %6 = vector.broadcast %cst_5 : f32 to vector<8x128xf32>
    %7 = arith.cmpf ogt, %5, %6 : vector<8x128xf32>
    %cst_6 = arith.constant 0.00999999977 : f32
    %8 = vector.broadcast %cst_6 : f32 to vector<8x128xf32>
    %9 = arith.mulf %8, %5 : vector<8x128xf32>
    %10 = arith.select %7, %5, %9 : vector<8x128xi1>, vector<8x128xf32>
    %c0_7 = arith.constant 0 : index
    %c0_8 = arith.constant 0 : index
    %11 = vector.load %arg4[%c0_7, %c0_8] : memref<8x128xf32, #tpu.memory_space<vmem>>, vector<8x128xf32>
    tpu.vector_store %arg4[%c0_7, %c0_8], %10 {strides = array<i32>} : memref<8x128xf32, #tpu.memory_space<vmem>>, vector<8x128xf32>,
    return
  }
  func.func @transform_0(%arg0: i32) -> (i32, i32) {
    %c0_i32 = arith.constant 0 : i32
    %c0_i32_0 = arith.constant 0 : i32
    return %arg0, %c0_i32 : i32, i32
  }
  func.func @transform_1(%arg0: i32) -> (i32, i32) {
    %c0_i32 = arith.constant 0 : i32
    %c0_i32_0 = arith.constant 0 : i32
    %c0_i32_1 = arith.constant 0 : i32
    return %c0_i32, %c0_i32_0 : i32, i32
  }
  func.func @transform_2(%arg0: i32) -> (i32, i32) {
    %c0_i32 = arith.constant 0 : i32
    %c0_i32_0 = arith.constant 0 : i32
    %c0_i32_1 = arith.constant 0 : i32
    return %c0_i32, %c0_i32_0 : i32, i32
  }
  func.func @transform_3(%arg0: i32) -> (i32, i32) {
    %c0_i32 = arith.constant 0 : i32
    %c0_i32_0 = arith.constant 0 : i32
    return %arg0, %c0_i32 : i32, i32
  }
}

module attributes {stable_mosaic.version = 11 : i64} {
  func.func @_xw_kernel(%arg0: i32, %arg1: memref<8x128xf32, #tpu.memory_space<vmem>>, %arg2: memref<128x128xbf16, #tpu.memory_space<vmem>>, %arg3: memref<1x128xf32, #tpu.memory_space<vmem>>, %arg4: memref<1x128xf32, #tpu.memory_space<vmem>>, %arg5: memref<8x128xbf16, #tpu.memory_space<vmem>>, %arg6: memref<8x1xf32, #tpu.memory_space<vmem>>, %arg7: memref<8x1xf32, #tpu.memory_space<vmem>>) attributes {dimension_semantics = [#tpu.dimension_semantics<parallel>], iteration_bounds = array<i64: 1>, scalar_prefetch = 0 : i64, scratch_operands = 0 : i64, tpu.core_type = #tpu.core_type<tc>, window_params = [{transform_indices = @transform_0, window_bounds = array<i64: 8, 128>}, {pipeline_mode = #tpu.pipeline_mode<synchronous>, transform_indices = @transform_1, window_bounds = array<i64: 128, 128>}, {pipeline_mode = #tpu.pipeline_mode<synchronous>, transform_indices = @transform_2, window_bounds = array<i64: 1, 128>}, {pipeline_mode = #tpu.pipeline_mode<synchronous>, transform_indices = @transform_3, window_bounds = array<i64: 1, 128>}, {transform_indices = @transform_4, window_bounds = array<i64: 8, 128>}, {transform_indices = @transform_5, window_bounds = array<i64: 8, 1>}, {transform_indices = @transform_6, window_bounds = array<i64: 8, 1>}]} {
    %c0 = arith.constant 0 : index
    %c0_0 = arith.constant 0 : index
    %0 = vector.load %arg1[%c0, %c0_0] : memref<8x128xf32, #tpu.memory_space<vmem>>, vector<8x128xf32>
    %1 = arith.truncf %0 : vector<8x128xf32> to vector<8x128xbf16>
    %c0_1 = arith.constant 0 : index
    %c0_2 = arith.constant 0 : index
    %2 = vector.load %arg2[%c0_1, %c0_2] : memref<128x128xbf16, #tpu.memory_space<vmem>>, vector<128x128xbf16>
    %cst = arith.constant dense<0.000000e+00> : vector<8x128xf32>
    %3 = tpu.matmul %1, %2, %cst {dimension_numbers = #tpu.dot_dimension_numbers<[1], [0], [0], [1], [0, 0, 1, 1], [], []>} : vector<8x128xbf16>, vector<128x128xbf16>, vector<8x128xf32> -> vector<8x128xf32>
    %4 = arith.truncf %3 : vector<8x128xf32> to vector<8x128xbf16>
    %c0_3 = arith.constant 0 : index
    %c0_4 = arith.constant 0 : index
    %5 = vector.load %arg5[%c0_3, %c0_4] : memref<8x128xbf16, #tpu.memory_space<vmem>>, vector<8x128xbf16>
    tpu.vector_store %arg5[%c0_3, %c0_4], %4 {strides = array<i32>} : memref<8x128xbf16, #tpu.memory_space<vmem>>, vector<8x128xbf16>,
    %c0_5 = arith.constant 0 : index
    %c0_6 = arith.constant 0 : index
    %6 = vector.load %arg4[%c0_5, %c0_6] : memref<1x128xf32, #tpu.memory_space<vmem>>, vector<1x128xf32>
    %7 = vector.broadcast %6 : vector<1x128xf32> to vector<8x128xf32>
    %8 = arith.mulf %3, %7 : vector<8x128xf32>
    %cst_7 = arith.constant dense<0.000000e+00> : vector<8xf32>
    %9 = vector.multi_reduction <add>, %8, %cst_7 [1] : vector<8x128xf32> to vector<8xf32>
    %10 = vector.shape_cast %9 : vector<8xf32> to vector<8x1xf32>
    %c0_8 = arith.constant 0 : index
    %c0_9 = arith.constant 0 : index
    %11 = vector.load %arg6[%c0_8, %c0_9] : memref<8x1xf32, #tpu.memory_space<vmem>>, vector<8x1xf32>
    tpu.vector_store %arg6[%c0_8, %c0_9], %10 {strides = array<i32>} : memref<8x1xf32, #tpu.memory_space<vmem>>, vector<8x1xf32>,
    %c0_10 = arith.constant 0 : index
    %c0_11 = arith.constant 0 : index
    %12 = vector.load %arg3[%c0_10, %c0_11] : memref<1x128xf32, #tpu.memory_space<vmem>>, vector<1x128xf32>
    %13 = vector.broadcast %12 : vector<1x128xf32> to vector<8x128xf32>
    %14 = arith.mulf %3, %13 : vector<8x128xf32>
    %cst_12 = arith.constant dense<0.000000e+00> : vector<8xf32>
    %15 = vector.multi_reduction <add>, %14, %cst_12 [1] : vector<8x128xf32> to vector<8xf32>
    %16 = vector.shape_cast %15 : vector<8xf32> to vector<8x1xf32>
    %c0_13 = arith.constant 0 : index
    %c0_14 = arith.constant 0 : index
    %17 = vector.load %arg7[%c0_13, %c0_14] : memref<8x1xf32, #tpu.memory_space<vmem>>, vector<8x1xf32>
    tpu.vector_store %arg7[%c0_13, %c0_14], %16 {strides = array<i32>} : memref<8x1xf32, #tpu.memory_space<vmem>>, vector<8x1xf32>,
    return
  }
  func.func @transform_0(%arg0: i32) -> (i32, i32) {
    %c0_i32 = arith.constant 0 : i32
    %c0_i32_0 = arith.constant 0 : i32
    return %arg0, %c0_i32 : i32, i32
  }
  func.func @transform_1(%arg0: i32) -> (i32, i32) {
    %c0_i32 = arith.constant 0 : i32
    %c0_i32_0 = arith.constant 0 : i32
    %c0_i32_1 = arith.constant 0 : i32
    return %c0_i32, %c0_i32_0 : i32, i32
  }
  func.func @transform_2(%arg0: i32) -> (i32, i32) {
    %c0_i32 = arith.constant 0 : i32
    %c0_i32_0 = arith.constant 0 : i32
    %c0_i32_1 = arith.constant 0 : i32
    return %c0_i32, %c0_i32_0 : i32, i32
  }
  func.func @transform_3(%arg0: i32) -> (i32, i32) {
    %c0_i32 = arith.constant 0 : i32
    %c0_i32_0 = arith.constant 0 : i32
    %c0_i32_1 = arith.constant 0 : i32
    return %c0_i32, %c0_i32_0 : i32, i32
  }
  func.func @transform_4(%arg0: i32) -> (i32, i32) {
    %c0_i32 = arith.constant 0 : i32
    %c0_i32_0 = arith.constant 0 : i32
    return %arg0, %c0_i32 : i32, i32
  }
  func.func @transform_5(%arg0: i32) -> (i32, i32) {
    %c0_i32 = arith.constant 0 : i32
    %c0_i32_0 = arith.constant 0 : i32
    return %arg0, %c0_i32 : i32, i32
  }
  func.func @transform_6(%arg0: i32) -> (i32, i32) {
    %c0_i32 = arith.constant 0 : i32
    %c0_i32_0 = arith.constant 0 : i32
    return %arg0, %c0_i32 : i32, i32
  }
}

module attributes {stable_mosaic.version = 11 : i64} {
  func.func @_attn_kernel(%arg0: i32, %arg1: i32, %arg2: memref<8x8xbf16, #tpu.memory_space<vmem>>, %arg3: memref<8x128xbf16, #tpu.memory_space<vmem>>, %arg4: memref<8x1xf32, #tpu.memory_space<vmem>>, %arg5: memref<1x8xf32, #tpu.memory_space<vmem>>, %arg6: memref<1x128xf32, #tpu.memory_space<vmem>>, %arg7: memref<8x128xf32, #tpu.memory_space<vmem>>, %arg8: memref<8x1xf32, #tpu.memory_space<vmem>>, %arg9: memref<8x1xf32, #tpu.memory_space<vmem>>, %arg10: memref<8x128xf32, #tpu.memory_space<vmem>>) attributes {dimension_semantics = [#tpu.dimension_semantics<parallel>, #tpu.dimension_semantics<arbitrary>], iteration_bounds = array<i64: 1, 1>, scalar_prefetch = 0 : i64, scratch_operands = 3 : i64, tpu.core_type = #tpu.core_type<tc>, window_params = [{transform_indices = @transform_0, window_bounds = array<i64: 8, 8>}, {transform_indices = @transform_1, window_bounds = array<i64: 8, 128>}, {transform_indices = @transform_2, window_bounds = array<i64: 8, 1>}, {transform_indices = @transform_3, window_bounds = array<i64: 1, 8>}, {pipeline_mode = #tpu.pipeline_mode<synchronous>, transform_indices = @transform_4, window_bounds = array<i64: 1, 128>}, {transform_indices = @transform_5, window_bounds = array<i64: 8, 128>}]} {
    %c0_i32 = arith.constant 0 : i32
    %0 = arith.cmpi eq, %arg1, %c0_i32 : i32
    %1 = arith.extui %0 : i1 to i32
    %c0_i32_0 = arith.constant 0 : i32
    %2 = arith.cmpi ne, %1, %c0_i32_0 : i32
    scf.if %2 {
      %cst_26 = arith.constant -1.000000e+30 : f32
      %43 = vector.broadcast %cst_26 : f32 to vector<8x1xf32>
      %c0_27 = arith.constant 0 : index
      %c0_28 = arith.constant 0 : index
      %44 = vector.load %arg8[%c0_27, %c0_28] : memref<8x1xf32, #tpu.memory_space<vmem>>, vector<8x1xf32>
      tpu.vector_store %arg8[%c0_27, %c0_28], %43 {strides = array<i32>} : memref<8x1xf32, #tpu.memory_space<vmem>>, vector<8x1xf32>,
      %cst_29 = arith.constant 0.000000e+00 : f32
      %45 = vector.broadcast %cst_29 : f32 to vector<8x1xf32>
      %c0_30 = arith.constant 0 : index
      %c0_31 = arith.constant 0 : index
      %46 = vector.load %arg9[%c0_30, %c0_31] : memref<8x1xf32, #tpu.memory_space<vmem>>, vector<8x1xf32>
      tpu.vector_store %arg9[%c0_30, %c0_31], %45 {strides = array<i32>} : memref<8x1xf32, #tpu.memory_space<vmem>>, vector<8x1xf32>,
      %cst_32 = arith.constant 0.000000e+00 : f32
      %47 = vector.broadcast %cst_32 : f32 to vector<8x128xf32>
      %c0_33 = arith.constant 0 : index
      %c0_34 = arith.constant 0 : index
      %48 = vector.load %arg10[%c0_33, %c0_34] : memref<8x128xf32, #tpu.memory_space<vmem>>, vector<8x128xf32>
      tpu.vector_store %arg10[%c0_33, %c0_34], %47 {strides = array<i32>} : memref<8x128xf32, #tpu.memory_space<vmem>>, vector<8x128xf32>,
    } else {
    }
    %c0 = arith.constant 0 : index
    %c0_1 = arith.constant 0 : index
    %3 = vector.load %arg2[%c0, %c0_1] : memref<8x8xbf16, #tpu.memory_space<vmem>>, vector<8x8xbf16>
    %4 = arith.extf %3 : vector<8x8xbf16> to vector<8x8xf32>
    %c0_2 = arith.constant 0 : index
    %c0_3 = arith.constant 0 : index
    %5 = vector.load %arg4[%c0_2, %c0_3] : memref<8x1xf32, #tpu.memory_space<vmem>>, vector<8x1xf32>
    %c0_4 = arith.constant 0 : index
    %c0_5 = arith.constant 0 : index
    %6 = vector.load %arg5[%c0_4, %c0_5] : memref<1x8xf32, #tpu.memory_space<vmem>>, vector<1x8xf32>
    %7 = vector.broadcast %5 : vector<8x1xf32> to vector<8x8xf32>
    %8 = vector.broadcast %6 : vector<1x8xf32> to vector<8x8xf32>
    %9 = arith.addf %7, %8 : vector<8x8xf32>
    %cst = arith.constant 0.000000e+00 : f32
    %10 = vector.broadcast %cst : f32 to vector<8x8xf32>
    %11 = arith.cmpf ogt, %9, %10 : vector<8x8xf32>
    %cst_6 = arith.constant 2.000000e-01 : f32
    %12 = vector.broadcast %cst_6 : f32 to vector<8x8xf32>
    %13 = arith.mulf %12, %9 : vector<8x8xf32>
    %14 = arith.select %11, %9, %13 : vector<8x8xi1>, vector<8x8xf32>
    %c0_7 = arith.constant 0 : index
    %c0_8 = arith.constant 0 : index
    %15 = vector.load %arg8[%c0_7, %c0_8] : memref<8x1xf32, #tpu.memory_space<vmem>>, vector<8x1xf32>
    %cst_9 = arith.constant dense<0xFF800000> : vector<8xf32>
    %16 = vector.multi_reduction <maximumf>, %14, %cst_9 [1] : vector<8x8xf32> to vector<8xf32>
    %17 = vector.shape_cast %16 : vector<8xf32> to vector<8x1xf32>
    %18 = arith.maximumf %15, %17 : vector<8x1xf32>
    %19 = vector.broadcast %18 : vector<8x1xf32> to vector<8x8xf32>
    %20 = arith.subf %14, %19 : vector<8x8xf32>
    %21 = math.exp %20 : vector<8x8xf32>
    %22 = arith.mulf %21, %4 : vector<8x8xf32>
    %23 = arith.subf %15, %18 : vector<8x1xf32>
    %24 = math.exp %23 : vector<8x1xf32>
    %c0_10 = arith.constant 0 : index
    %c0_11 = arith.constant 0 : index
    %25 = vector.load %arg9[%c0_10, %c0_11] : memref<8x1xf32, #tpu.memory_space<vmem>>, vector<8x1xf32>
    %26 = arith.mulf %24, %25 : vector<8x1xf32>
    %cst_12 = arith.constant dense<0.000000e+00> : vector<8xf32>
    %27 = vector.multi_reduction <add>, %22, %cst_12 [1] : vector<8x8xf32> to vector<8xf32>
    %28 = vector.shape_cast %27 : vector<8xf32> to vector<8x1xf32>
    %29 = arith.addf %26, %28 : vector<8x1xf32>
    %c0_13 = arith.constant 0 : index
    %c0_14 = arith.constant 0 : index
    %30 = vector.load %arg9[%c0_13, %c0_14] : memref<8x1xf32, #tpu.memory_space<vmem>>, vector<8x1xf32>
    tpu.vector_store %arg9[%c0_13, %c0_14], %29 {strides = array<i32>} : memref<8x1xf32, #tpu.memory_space<vmem>>, vector<8x1xf32>,
    %c0_15 = arith.constant 0 : index
    %c0_16 = arith.constant 0 : index
    %31 = vector.load %arg10[%c0_15, %c0_16] : memref<8x128xf32, #tpu.memory_space<vmem>>, vector<8x128xf32>
    %32 = vector.broadcast %24 : vector<8x1xf32> to vector<8x128xf32>
    %33 = arith.mulf %32, %31 : vector<8x128xf32>
    %34 = arith.truncf %22 : vector<8x8xf32> to vector<8x8xbf16>
    %c0_17 = arith.constant 0 : index
    %c0_18 = arith.constant 0 : index
    %35 = vector.load %arg3[%c0_17, %c0_18] : memref<8x128xbf16, #tpu.memory_space<vmem>>, vector<8x128xbf16>
    %cst_19 = arith.constant dense<0.000000e+00> : vector<8x128xf32>
    %36 = tpu.matmul %34, %35, %cst_19 {dimension_numbers = #tpu.dot_dimension_numbers<[1], [0], [0], [1], [0, 0, 1, 1], [], []>} : vector<8x8xbf16>, vector<8x128xbf16>, vector<8x128xf32> -> vector<8x128xf32>
    %37 = arith.addf %33, %36 : vector<8x128xf32>
    %c0_20 = arith.constant 0 : index
    %c0_21 = arith.constant 0 : index
    %38 = vector.load %arg10[%c0_20, %c0_21] : memref<8x128xf32, #tpu.memory_space<vmem>>, vector<8x128xf32>
    tpu.vector_store %arg10[%c0_20, %c0_21], %37 {strides = array<i32>} : memref<8x128xf32, #tpu.memory_space<vmem>>, vector<8x128xf32>,
    %c0_22 = arith.constant 0 : index
    %c0_23 = arith.constant 0 : index
    %39 = vector.load %arg8[%c0_22, %c0_23] : memref<8x1xf32, #tpu.memory_space<vmem>>, vector<8x1xf32>
    tpu.vector_store %arg8[%c0_22, %c0_23], %18 {strides = array<i32>} : memref<8x1xf32, #tpu.memory_space<vmem>>, vector<8x1xf32>,
    %c0_i32_24 = arith.constant 0 : i32
    %40 = arith.cmpi eq, %arg1, %c0_i32_24 : i32
    %41 = arith.extui %40 : i1 to i32
    %c0_i32_25 = arith.constant 0 : i32
    %42 = arith.cmpi ne, %41, %c0_i32_25 : i32
    scf.if %42 {
      %c0_26 = arith.constant 0 : index
      %c0_27 = arith.constant 0 : index
      %43 = vector.load %arg9[%c0_26, %c0_27] : memref<8x1xf32, #tpu.memory_space<vmem>>, vector<8x1xf32>
      %cst_28 = arith.constant 0.000000e+00 : f32
      %44 = vector.broadcast %cst_28 : f32 to vector<8x1xf32>
      %45 = arith.cmpf ogt, %43, %44 : vector<8x1xf32>
      %cst_29 = arith.constant 1.000000e-30 : f32
      %46 = vector.broadcast %cst_29 : f32 to vector<8x1xf32>
      %47 = arith.maximumf %43, %46 : vector<8x1xf32>
      %48 = tpu.reciprocal %47 {approx = true} : vector<8x1xf32> -> vector<8x1xf32>
      %cst_30 = arith.constant 0.000000e+00 : f32
      %49 = vector.broadcast %cst_30 : f32 to vector<8x1xf32>
      %50 = arith.select %45, %48, %49 : vector<8x1xi1>, vector<8x1xf32>
      %c0_31 = arith.constant 0 : index
      %c0_32 = arith.constant 0 : index
      %51 = vector.load %arg10[%c0_31, %c0_32] : memref<8x128xf32, #tpu.memory_space<vmem>>, vector<8x128xf32>
      %52 = vector.broadcast %50 : vector<8x1xf32> to vector<8x128xf32>
      %53 = arith.mulf %51, %52 : vector<8x128xf32>
      %c0_33 = arith.constant 0 : index
      %c0_34 = arith.constant 0 : index
      %54 = vector.load %arg6[%c0_33, %c0_34] : memref<1x128xf32, #tpu.memory_space<vmem>>, vector<1x128xf32>
      %55 = vector.broadcast %54 : vector<1x128xf32> to vector<8x128xf32>
      %56 = arith.addf %53, %55 : vector<8x128xf32>
      %cst_35 = arith.constant 0.000000e+00 : f32
      %57 = vector.broadcast %cst_35 : f32 to vector<8x128xf32>
      %58 = arith.cmpf ogt, %56, %57 : vector<8x128xf32>
      %cst_36 = arith.constant 0.00999999977 : f32
      %59 = vector.broadcast %cst_36 : f32 to vector<8x128xf32>
      %60 = arith.mulf %59, %56 : vector<8x128xf32>
      %61 = arith.select %58, %56, %60 : vector<8x128xi1>, vector<8x128xf32>
      %c0_37 = arith.constant 0 : index
      %c0_38 = arith.constant 0 : index
      %62 = vector.load %arg7[%c0_37, %c0_38] : memref<8x128xf32, #tpu.memory_space<vmem>>, vector<8x128xf32>
      tpu.vector_store %arg7[%c0_37, %c0_38], %61 {strides = array<i32>} : memref<8x128xf32, #tpu.memory_space<vmem>>, vector<8x128xf32>,
    } else {
    }
    return
  }
  func.func @transform_0(%arg0: i32, %arg1: i32) -> (i32, i32) {
    %c0_i32 = arith.constant 0 : i32
    return %arg0, %arg1 : i32, i32
  }
  func.func @transform_1(%arg0: i32, %arg1: i32) -> (i32, i32) {
    %c0_i32 = arith.constant 0 : i32
    %c0_i32_0 = arith.constant 0 : i32
    return %arg1, %c0_i32 : i32, i32
  }
  func.func @transform_2(%arg0: i32, %arg1: i32) -> (i32, i32) {
    %c0_i32 = arith.constant 0 : i32
    %c0_i32_0 = arith.constant 0 : i32
    return %arg0, %c0_i32 : i32, i32
  }
  func.func @transform_3(%arg0: i32, %arg1: i32) -> (i32, i32) {
    %c0_i32 = arith.constant 0 : i32
    %c0_i32_0 = arith.constant 0 : i32
    return %c0_i32, %arg1 : i32, i32
  }
  func.func @transform_4(%arg0: i32, %arg1: i32) -> (i32, i32) {
    %c0_i32 = arith.constant 0 : i32
    %c0_i32_0 = arith.constant 0 : i32
    %c0_i32_1 = arith.constant 0 : i32
    return %c0_i32, %c0_i32_0 : i32, i32
  }
  func.func @transform_5(%arg0: i32, %arg1: i32) -> (i32, i32) {
    %c0_i32 = arith.constant 0 : i32
    %c0_i32_0 = arith.constant 0 : i32
    return %arg0, %c0_i32 : i32, i32
  }
}

</mosaic_0001>

<bundles_post_ra>
// kernel: graph_encoder_forward.10
= control target key start
LH: loop header
LB: loop body
LE: loop exit
PB: predicated region body
PF: predicated region fallthrough
CT: control target
= control target key end

     0   :  { %v213_v0 = vmov 0.0   ;;  %vm214_vm0 = vmmov 0   ;;  %vm139_vm1 = vcmask 7168   ;;  %s292_s1 = inlined_call_operand.vmem [shape: bf16[128,128], index: 1, kind: input, shape index: {}]   ;;  %s293_s0 = inlined_call_operand.vmem [shape: f32[8,128], index: 0, kind: input, shape index: {}]   ;;  %s294_s3 = inlined_call_operand.vmem [shape: f32[1,128], index: 3, kind: input, shape index: {}]   ;;  %s295_s2 = inlined_call_operand.vmem [shape: f32[1,128], index: 2, kind: input, shape index: {}]   ;;  %s296_s4 = inlined_call_operand.vmem [shape: bf16[8,128], index: 4, kind: output, shape index: {0}]   ;;  %s297_s5 = inlined_call_operand.vmem [shape: f32[8,1], index: 5, kind: output, shape index: {1}]   ;;  %s298_s6 = inlined_call_operand.vmem [shape: f32[8,1], index: 6, kind: output, shape index: {2}]  }
   0x1   :  { %183 = vmatprep.subr.bf16.mxu0 %v213_v0  ;;  %v205_v1 = vld [vmem:[%s292_s1 + $0x38] sm:$0xff]   ;;  %199 = vmatprep.mubr.msk.bf16.mxu0 %vm214_vm0, %v213_v0  ;;  %v206_v2 = vld [vmem:[%s292_s1 + $0x30] sm:$0xff]   ;;  %v207_v3 = vld [vmem:[%s292_s1 + $0x28] sm:$0xff]  }
   0x2   :  { %184 = vmatpush3.bf16.msra.mxu0 %v205_v1  ;;  %v208_v4 = vld [vmem:[%s292_s1 + $0x20] sm:$0xff]   ;;  %v209_v5 = vld [vmem:[%s292_s1 + $0x18] sm:$0xff]   ;;  %v210_v6 = vld [vmem:[%s292_s1 + $0x10] sm:$0xff]  }
   0x3   :  { %185 = vmatprep.subr.bf16.mxu0 %v213_v0  ;;  %v211_v7 = vld [vmem:[%s292_s1 + $0x8] sm:$0xff]   ;;  %v212_v8 = vld [vmem:[%s292_s1] sm:$0xff]  }
   0x4   :  { %v21_v9 = vld [vmem:[%s293_s0] sm:$0xff] }
   0x5   :  { %v22_v10 = vpack.c.bf16 %v21_v9, %v21_v9  ;;  %v172_v11 = vld [vmem:[%s294_s3] ss:$0 sm:$0xff] }
   0x6   :  { %186 = vmatpush3.bf16.msra.mxu0 %v206_v2  ;;  %v173_v16 = vld [vmem:[%s295_s2] ss:$0 sm:$0xff] }
   0x7   :  { %187 = vmatprep.subr.bf16.mxu0 %v213_v0 }
   0xa   :  { %188 = vmatpush3.bf16.msra.mxu0 %v207_v3 }
   0xb   :  { %189 = vmatprep.subr.bf16.mxu0 %v213_v0 }
   0xe   :  { %190 = vmatpush3.bf16.msra.mxu0 %v208_v4 }
   0xf   :  { %191 = vmatprep.subr.bf16.mxu0 %v213_v0 }
  0x12   :  { %192 = vmatpush3.bf16.msra.mxu0 %v209_v5 }
  0x13   :  { %193 = vmatprep.subr.bf16.mxu0 %v213_v0 }
  0x16   :  { %194 = vmatpush3.bf16.msra.mxu0 %v210_v6 }
  0x17   :  { %195 = vmatprep.subr.bf16.mxu0 %v213_v0 }
  0x1a   :  { %196 = vmatpush3.bf16.msra.mxu0 %v211_v7 }
  0x1b   :  { %197 = vmatprep.subr.bf16.mxu0 %v213_v0 }
  0x1e   :  { %198 = vmatpush3.bf16.msra.mxu0 %v212_v8 }
  0x21   :  { %200 = vmatmul.mubr.bf16.vlgmr.msra.gmra.mxu0 %v22_v10 }
  0xe1   :  { %v121_v12 = vpop.f32.mrf.mxu0 }
  0xe2   :  { %v127_v13 = vpack.c.bf16 %v121_v12, %v121_v12  ;;  %v136_v14 = vmul.f32 %v172_v11, %v121_v12  ;;  %v148_v18 = vmul.f32 %v173_v16, %v121_v12 }
  0xe3   :  { %v201_v15 = vpop.f32.mrf.mxu0 }
  0xe4   :  { %128 = vst [vmem:[%s296_s4] sm:$0xf] %v127_v13  ;;  %137 = vadd.xlane.f32.xlu0 %v136_v14 }
  0xe5   :  { %v124_v17 = vpop.f32.mrf.mxu0 }
  0xe7   :  { %v202_v19 = vpop.f32.mrf.mxu0 }
  0xe8   :  { %149 = vadd.xlane.f32.xlu0 %v148_v18 }
 0x16d   :  { %v138_v20 = vpop.xlane.xlu0 %137 }
 0x16e   :  { %140 = vst.msk [vmem:[%s297_s5] sm:$0xff] %vm139_vm1, %v138_v20 }
 0x171   :  { %v150_v21 = vpop.xlane.xlu0 %149 }
 0x172   :  { %151 = vst.msk [vmem:[%s298_s6] sm:$0xff] %vm139_vm1, %v150_v21 }

// kernel: graph_encoder_forward.9
= control target key start
LH: loop header
LB: loop body
LE: loop exit
PB: predicated region body
PF: predicated region fallthrough
CT: control target
= control target key end

     0   :  { %v120_v0 = vmov 0.0   ;;  %vm121_vm0 = vmmov 0   ;;  %vm24_vm1 = vcmask 130048   ;;  %s157_s1 = inlined_call_operand.vmem [shape: f32[16,128], index: 1, kind: input, shape index: {}]   ;;  %s158_s0 = inlined_call_operand.vmem [shape: f32[8,16], index: 0, kind: input, shape index: {}]   ;;  %s159_s2 = inlined_call_operand.vmem [shape: f32[1,128], index: 2, kind: input, shape index: {}]   ;;  %s160_s3 = inlined_call_operand.vmem [shape: f32[8,128], index: 3, kind: output, shape index: {}]  }
   0x1   :  { %111 = vmatprep.subr.mxu0 %v120_v0  ;;  %v16_v1 = vld [vmem:[%s157_s1 + $0x8] sm:$0xff]  ;;  %v15_v2 = vld [vmem:[%s157_s1] sm:$0xff]  ;;  %115 = vmatprep.mubr.msk.f32.mxu0 %vm121_vm0, %v120_v0 }
   0x2   :  { %112 = vmatpush3.msra.mxu0 %v16_v1  ;;  %v14_v3 = vld [vmem:[%s158_s0] sm:$0xff] }
   0x3   :  { %113 = vmatprep.subr.mxu0 %v120_v0  ;;  %v106_v4 = vld [vmem:[%s159_s2] ss:$0 sm:$0xff] }
   0x4   :  { %114 = vmatpush3.msra.mxu0 %v15_v2 }
   0x5   :  { %116 = vmatmul.mubr.msk.f32.vlgmr.msra.gmra.mxu0 %vm24_vm1, %v14_v3 }
  0xc5   :  { %v94_v5 = vpop.f32.mrf.mxu0 }
  0xc6   :  { %v95_v6 = vadd.f32 %v106_v4, %v94_v5 }
  0xc7   :  { %v117_v7 = vpop.f32.mrf.mxu0 }
  0xc8   :  { %vm98_vm2 = vcmp.gt.f32.partialorder %v95_v6, 0.0  ;;  %v99_v8 = vmul.f32 0.01, %v95_v6 }
  0xca   :  { %v100_v9 = vsel %vm98_vm2, %v95_v6, %v99_v8 }
  0xcb   :  { %101 = vst [vmem:[%s160_s3] sm:$0xff] %v100_v9 }

// kernel: graph_encoder_forward.11
= control target key start
LH: loop header
LB: loop body
LE: loop exit
PB: predicated region body
PF: predicated region fallthrough
CT: control target
= control target key end

     0   :  { %v187_v0 = vmov 0   ;;  %vm25_vm0 = vcmask 7168   ;;  %v188_v2 = vmov -1e+30   ;;  %vm49_vm2 = vcmask 64512   ;;  %s246_s2 = inlined_call_operand.vmem [shape: f32[8,1], index: 2, kind: input, shape index: {}]   ;;  %s247_s3 = inlined_call_operand.vmem [shape: f32[1,8], index: 3, kind: input, shape index: {}]   ;;  %s248_s1 = inlined_call_operand.vmem [shape: bf16[8,128], index: 1, kind: input, shape index: {}]   ;;  %s249_s0 = inlined_call_operand.vmem [shape: bf16[8,8], index: 0, kind: input, shape index: {}]   ;;  %s250_s4 = inlined_call_operand.vmem [shape: f32[1,128], index: 4, kind: input, shape index: {}]   ;;  %s251_s5 = inlined_call_operand.vmem [shape: f32[8,128], index: 5, kind: output, shape index: {}]  }
   0x1   :  { %179 = vset.pattern.permute.xlu0 %v187_v0  ;;  %v31_v1 = vld [vmem:[%s246_s2] sm:$0xff]  ;;  %180 = vset.pattern.permute.xlu1 %v187_v0  ;;  %26 = vst.msk [vmem:[#allocation2] sm:$0xff] %vm25_vm0, %v188_v2  ;;  %v189_v9 = vmov 0.0   ;;  %vm86_vm3 = vcmask 1043456   ;;  %vm190_vm4 = vmmov 0  }
   0x2   :  { %35 = vperm.xlu0 %179, %v31_v1   ;;  %v164_v3 = vld [vmem:[%s247_s3] ss:$0 sm:$0xff]  ;;  %27 = vst.msk [vmem:[#allocation3] sm:$0xff] %vm25_vm0, %v189_v9  ;;  %169 = vmatprep.subr.bf16.mxu0 %v189_v9 }
   0x3   :  { %v82_v15 = vld [vmem:[%s248_s1] sm:$0xf]  ;;  %171 = vmatprep.mubr.msk.bf16.mxu0 %vm190_vm4, %v189_v9 }
   0x4   :  { %v88_v16 = vsel %vm86_vm3, %v82_v15, 0  ;;  %v29_v21 = vld [vmem:[%s249_s0] sm:$0xf] }
   0x5   :  { %170 = vmatpush3.bf16.msra.mxu0 %v88_v16  ;;  %v30_v22 = vunpack.c.l.bf16 %v29_v21  ;;  %v166_v42 = vld [vmem:[%s250_s4] ss:$0 sm:$0xff] }
   0x8   :  { %v48_v10 = vld [vmem:[#allocation2] sm:$0xff] }
   0x9   :  { %v66_v27 = vld [vmem:[#allocation3] sm:$0xff] }
  0x7d   :  { %v36_v4 = vpop.permute.xlu0 %35 }
  0x7e   :  { %v44_v5 = vadd.f32 %v164_v3, %v36_v4 }
  0x80   :  { %v46_v6 = vmul.f32 0.2, %v44_v5  ;;  %vm45_vm1 = vcmp.gt.f32.partialorder %v44_v5, 0.0 }
  0x82   :  { %v47_v7 = vsel %vm45_vm1, %v44_v5, %v46_v6 }
  0x83   :  { %v50_v8 = vsel %vm49_vm2, %v47_v7, -inf }
  0x84   :  { %51 = vmax.xlane.f32.xlu0 %v50_v8 }
 0x10d   :  { %v52_v11 = vpop.xlane.xlu0 %51 }
 0x10e   :  { %v53_v12 = vmax.f32 %v48_v10, %v52_v11 }
 0x110   :  { %v63_v13 = vsub.f32 %v48_v10, %v53_v12  ;;  %132 = vst.msk [vmem:[#allocation2] sm:$0xff] %vm25_vm0, %v53_v12  ;;  %56 = vperm.xlu1 %180, %v53_v12  }
 0x112   :  { %v64_v14 = vmul.f32 1.442695, %v63_v13 }
 0x114   :  { %181 = vpow2.f32 %v64_v14 }
 0x121   :  { %v182_v17 = vpop.eup %181 }
 0x122   :  { %77 = vperm.xlu0 %179, %v182_v17   ;;  %v67_v28 = vmul.f32 %v182_v17, %v66_v27 }
 0x18b   :  { %v57_v18 = vpop.permute.xlu1 %56 }
 0x18c   :  { %v59_v19 = vsub.f32 %v47_v7, %v57_v18 }
 0x18e   :  { %v60_v20 = vmul.f32 1.442695, %v59_v19 }
 0x190   :  { %183 = vpow2.f32 %v60_v20 }
 0x19d   :  { %v184_v23 = vpop.eup %183  ;;  %v78_v39 = vpop.permute.xlu0 %77 }
 0x19e   :  { %v62_v24 = vmul.f32 %v184_v23, %v30_v22  ;;  %v80_v40 = vmul.f32 0.0, %v78_v39 }
 0x1a0   :  { %v68_v25 = vsel %vm49_vm2, %v62_v24, 0.0  ;;  %v81_v26 = vpack.c.bf16 %v62_v24, %v62_v24 }
 0x1a1   :  { %69 = vadd.xlane.f32.xlu1 %v68_v25 }
 0x1a2   :  { %172 = vmatmul.mubr.msk.bf16.vlgmr.msra.gmra.mxu0 %vm49_vm2, %v81_v26 }
 0x22a   :  { %v70_v29 = vpop.xlane.xlu1 %69 }
 0x22b   :  { %v71_v30 = vadd.f32 %v70_v29, %v67_v28 }
 0x22d   :  { %73 = vst.msk [vmem:[#allocation3] sm:$0xff] %vm25_vm0, %v71_v30 }
 0x234   :  { %v136_v31 = vld [vmem:[#allocation3] sm:$0xff] }
 0x235   :  { %v138_v32 = vmax.f32 %v136_v31, 1e-30  ;;  %vm137_vm5 = vcmp.gt.f32.partialorder %v136_v31, 0.0 }
 0x237   :  { %185 = vrcp.f32 %v138_v32 }
 0x244   :  { %v186_v33 = vpop.eup %185 }
 0x245   :  { %v140_v34 = vsel %vm137_vm5, %v186_v33, 0.0 }
 0x246   :  { %144 = vperm.xlu1 %180, %v140_v34  }
 0x262   :  { %v124_v35 = vpop.f32.mrf.mxu0 }
 0x263   :  { %v130_v41 = vadd.f32 %v124_v35, %v80_v40 }
 0x264   :  { %v173_v36 = vpop.f32.mrf.mxu0 }
 0x266   :  { %v127_v37 = vpop.f32.mrf.mxu0 }
 0x268   :  { %v174_v38 = vpop.f32.mrf.mxu0 }
 0x2c1   :  { %v145_v43 = vpop.permute.xlu1 %144 }
 0x2c2   :  { %v147_v44 = vmul.f32 %v145_v43, %v130_v41 }
 0x2c4   :  { %v155_v45 = vadd.f32 %v166_v42, %v147_v44 }
 0x2c6   :  { %vm156_vm6 = vcmp.gt.f32.partialorder %v155_v45, 0.0  ;;  %v157_v46 = vmul.f32 0.01, %v155_v45 }
 0x2c8   :  { %v158_v47 = vsel %vm156_vm6, %v155_v45, %v157_v46 }
 0x2c9   :  { %159 = vst [vmem:[%s251_s5] sm:$0xff] %v158_v47 }

</bundles_post_ra>
